<compile_context>
chip_gen: v7x
topology: tpu7x:2x2x1
jax: 0.10.0
libtpu: 0.0.40
codegen_flags: <defaults>
</compile_context>

<pallas_src>
import functools

import jax
import jax.numpy as jnp
from jax.experimental import pallas as pl
from jax.experimental.pallas import tpu as pltpu

LANE = 128  # vreg / MXU lane width


def mlp_kernel(x_ref, w1_ref, b1_ref, w2_ref, b2_ref, w3_ref, b3_ref, o_ref):
    # x_ref: (TB, 128) bf16; w*_ref: (128, 128) bf16; b*_ref: (1, 128) f32.
    x = x_ref[...]

    # fc1 + relu (bf16 MXU operands, f32 accumulate, f32 epilogue)
    h1 = jnp.dot(x, w1_ref[...], preferred_element_type=jnp.float32)
    h1 = jnp.maximum(h1 + b1_ref[...], 0.0)

    # fc2 + relu
    h2 = jnp.dot(h1.astype(jnp.bfloat16), w2_ref[...],
                 preferred_element_type=jnp.float32)
    h2 = jnp.maximum(h2 + b2_ref[...], 0.0)

    # fc3 (lane-padded: real logit is column 0 of the 128-wide result)
    h3 = jnp.dot(h2.astype(jnp.bfloat16), w3_ref[...],
                 preferred_element_type=jnp.float32)
    h3 = h3 + b3_ref[...]

    # Numerically stable sigmoid; reciprocal goes to the EUP (approx vrcp).
    e = jnp.exp(-jnp.abs(h3))                     # in (0, 1], no overflow
    num = jnp.where(h3 >= 0.0, 1.0, e)
    o_ref[...] = num * pl.reciprocal(1.0 + e, approx=True)


def _pad2d(a, rows, cols):
    r, c = a.shape
    return jnp.pad(a, ((0, rows - r), (0, cols - c)))


def pad_linear(w, b):
    """w: (fan_in, fan_out) pre-transposed weight, b: (fan_out,) bias.

    Returns a (128,128) bf16 weight and (1,128) f32 bias, zero-padded so the
    extra lanes contribute exactly zero downstream.
    """
    wp = _pad2d(w, LANE, LANE).astype(jnp.bfloat16)
    bp = _pad2d(b.reshape(1, -1), 1, LANE).astype(jnp.float32)
    return wp, bp


@functools.partial(jax.jit, static_argnames=("tb",))
def mlp_forward(x, w1p, b1p, w2p, b2p, w3p, b3p, *, tb=32):
    """x: (B, in_features) f32.  Padded params from pad_linear.  Returns (B, 1) f32."""
    B, F = x.shape
    n_tiles = pl.cdiv(B, tb)
    Bp = n_tiles * tb
    # Pad batch to a tile multiple and features to the 128-lane width; bf16 in.
    xp = _pad2d(x, Bp, LANE).astype(jnp.bfloat16)

    x_spec = pl.BlockSpec((tb, LANE), lambda i: (i, 0))
    o_spec = pl.BlockSpec((tb, LANE), lambda i: (i, 0))
    w_spec = pl.BlockSpec((LANE, LANE), lambda i: (0, 0))   # resident weights
    b_spec = pl.BlockSpec((1, LANE), lambda i: (0, 0))      # resident biases

    out = pl.pallas_call(
        mlp_kernel,
        out_shape=jax.ShapeDtypeStruct((Bp, LANE), jnp.float32),
        grid=(n_tiles,),
        in_specs=[x_spec, w_spec, b_spec, w_spec, b_spec, w_spec, b_spec],
        out_specs=o_spec,
        compiler_params=pltpu.CompilerParams(
            dimension_semantics=("parallel",)),
    )(xp, w1p, b1p, w2p, b2p, w3p, b3p)

    # Lane-dense slab -> slice the real logit column, drop batch padding.
    return out[:B, :1]


def init_linear(key, fan_in, fan_out):
    """PyTorch-style uniform init; weight pre-transposed to (fan_in, fan_out)."""
    kw, kb = jax.random.split(key)
    bound = 1.0 / jnp.sqrt(jnp.float32(fan_in))
    w = jax.random.uniform(kw, (fan_in, fan_out), jnp.float32, -bound, bound)
    b = jax.random.uniform(kb, (fan_out,), jnp.float32, -bound, bound)
    return w, b


if __name__ == "__main__":
    key = jax.random.PRNGKey(0)
    k_x, k1, k2, k3 = jax.random.split(key, 4)

    BATCH, IN_FEATURES = 64, 16   # X.shape[1] = 16 for this synthetic run
    TB = 32                       # batch tile (multiple of 16 for bf16 sublanes)

    x = jax.random.normal(k_x, (BATCH, IN_FEATURES), jnp.float32)

    w1, b1 = init_linear(k1, IN_FEATURES, 64)
    w2, b2 = init_linear(k2, 64, 32)
    w3, b3 = init_linear(k3, 32, 1)

    w1p, b1p = pad_linear(w1, b1)
    w2p, b2p = pad_linear(w2, b2)
    w3p, b3p = pad_linear(w3, b3)

    out = mlp_forward(x, w1p, b1p, w2p, b2p, w3p, b3p, tb=TB)
    jax.block_until_ready(out)

    # Plain-JAX f32 reference (unpadded weights).
    ref = jnp.maximum(x @ w1 + b1, 0.0)
    ref = jnp.maximum(ref @ w2 + b2, 0.0)
    ref = jax.nn.sigmoid(ref @ w3 + b3)

    assert out.shape == (BATCH, 1), out.shape
    assert bool(jnp.all(jnp.isfinite(out))), "non-finite output"
    # bf16 matmul operands + approx reciprocal -> loosened tolerance.
    assert jnp.allclose(out, ref, atol=2e-2), (
        f"mismatch vs JAX reference, max err {jnp.max(jnp.abs(out - ref))}")

    print("KERNEL_OK")
</pallas_src>

<mosaic_0001>
module attributes {stable_mosaic.version = 11 : i64} {
  func.func @mlp_kernel(%arg0: i32, %arg1: memref<32x128xbf16, #tpu.memory_space<vmem>>, %arg2: memref<128x128xbf16, #tpu.memory_space<vmem>>, %arg3: memref<1x128xf32, #tpu.memory_space<vmem>>, %arg4: memref<128x128xbf16, #tpu.memory_space<vmem>>, %arg5: memref<1x128xf32, #tpu.memory_space<vmem>>, %arg6: memref<128x128xbf16, #tpu.memory_space<vmem>>, %arg7: memref<1x128xf32, #tpu.memory_space<vmem>>, %arg8: memref<32x128xf32, #tpu.memory_space<vmem>>) attributes {dimension_semantics = [#tpu.dimension_semantics<parallel>], iteration_bounds = array<i64: 2>, scalar_prefetch = 0 : i64, scratch_operands = 0 : i64, tpu.core_type = #tpu.core_type<tc>, window_params = [{transform_indices = @transform_0, window_bounds = array<i64: 32, 128>}, {pipeline_mode = #tpu.pipeline_mode<synchronous>, transform_indices = @transform_1, window_bounds = array<i64: 128, 128>}, {pipeline_mode = #tpu.pipeline_mode<synchronous>, transform_indices = @transform_2, window_bounds = array<i64: 1, 128>}, {pipeline_mode = #tpu.pipeline_mode<synchronous>, transform_indices = @transform_3, window_bounds = array<i64: 128, 128>}, {pipeline_mode = #tpu.pipeline_mode<synchronous>, transform_indices = @transform_4, window_bounds = array<i64: 1, 128>}, {pipeline_mode = #tpu.pipeline_mode<synchronous>, transform_indices = @transform_5, window_bounds = array<i64: 128, 128>}, {pipeline_mode = #tpu.pipeline_mode<synchronous>, transform_indices = @transform_6, window_bounds = array<i64: 1, 128>}, {transform_indices = @transform_7, window_bounds = array<i64: 32, 128>}]} {
    %c0 = arith.constant 0 : index
    %c0_0 = arith.constant 0 : index
    %0 = vector.load %arg1[%c0, %c0_0] : memref<32x128xbf16, #tpu.memory_space<vmem>>, vector<32x128xbf16>
    %c0_1 = arith.constant 0 : index
    %c0_2 = arith.constant 0 : index
    %1 = vector.load %arg2[%c0_1, %c0_2] : memref<128x128xbf16, #tpu.memory_space<vmem>>, vector<128x128xbf16>
    %cst = arith.constant dense<0.000000e+00> : vector<32x128xf32>
    %2 = tpu.matmul %0, %1, %cst {dimension_numbers = #tpu.dot_dimension_numbers<[1], [0], [0], [1], [0, 0, 1, 1], [], []>} : vector<32x128xbf16>, vector<128x128xbf16>, vector<32x128xf32> -> vector<32x128xf32>
    %c0_3 = arith.constant 0 : index
    %c0_4 = arith.constant 0 : index
    %3 = vector.load %arg3[%c0_3, %c0_4] : memref<1x128xf32, #tpu.memory_space<vmem>>, vector<1x128xf32>
    %4 = vector.broadcast %3 : vector<1x128xf32> to vector<32x128xf32>
    %5 = arith.addf %2, %4 : vector<32x128xf32>
    %cst_5 = arith.constant 0.000000e+00 : f32
    %6 = vector.broadcast %cst_5 : f32 to vector<32x128xf32>
    %7 = arith.maximumf %5, %6 : vector<32x128xf32>
    %8 = arith.truncf %7 : vector<32x128xf32> to vector<32x128xbf16>
    %c0_6 = arith.constant 0 : index
    %c0_7 = arith.constant 0 : index
    %9 = vector.load %arg4[%c0_6, %c0_7] : memref<128x128xbf16, #tpu.memory_space<vmem>>, vector<128x128xbf16>
    %cst_8 = arith.constant dense<0.000000e+00> : vector<32x128xf32>
    %10 = tpu.matmul %8, %9, %cst_8 {dimension_numbers = #tpu.dot_dimension_numbers<[1], [0], [0], [1], [0, 0, 1, 1], [], []>} : vector<32x128xbf16>, vector<128x128xbf16>, vector<32x128xf32> -> vector<32x128xf32>
    %c0_9 = arith.constant 0 : index
    %c0_10 = arith.constant 0 : index
    %11 = vector.load %arg5[%c0_9, %c0_10] : memref<1x128xf32, #tpu.memory_space<vmem>>, vector<1x128xf32>
    %12 = vector.broadcast %11 : vector<1x128xf32> to vector<32x128xf32>
    %13 = arith.addf %10, %12 : vector<32x128xf32>
    %cst_11 = arith.constant 0.000000e+00 : f32
    %14 = vector.broadcast %cst_11 : f32 to vector<32x128xf32>
    %15 = arith.maximumf %13, %14 : vector<32x128xf32>
    %16 = arith.truncf %15 : vector<32x128xf32> to vector<32x128xbf16>
    %c0_12 = arith.constant 0 : index
    %c0_13 = arith.constant 0 : index
    %17 = vector.load %arg6[%c0_12, %c0_13] : memref<128x128xbf16, #tpu.memory_space<vmem>>, vector<128x128xbf16>
    %cst_14 = arith.constant dense<0.000000e+00> : vector<32x128xf32>
    %18 = tpu.matmul %16, %17, %cst_14 {dimension_numbers = #tpu.dot_dimension_numbers<[1], [0], [0], [1], [0, 0, 1, 1], [], []>} : vector<32x128xbf16>, vector<128x128xbf16>, vector<32x128xf32> -> vector<32x128xf32>
    %c0_15 = arith.constant 0 : index
    %c0_16 = arith.constant 0 : index
    %19 = vector.load %arg7[%c0_15, %c0_16] : memref<1x128xf32, #tpu.memory_space<vmem>>, vector<1x128xf32>
    %20 = vector.broadcast %19 : vector<1x128xf32> to vector<32x128xf32>
    %21 = arith.addf %18, %20 : vector<32x128xf32>
    %22 = math.absf %21 : vector<32x128xf32>
    %cst_17 = arith.constant 0.000000e+00 : f32
    %23 = vector.broadcast %cst_17 : f32 to vector<32x128xf32>
    %24 = arith.subf %23, %22 : vector<32x128xf32>
    %25 = math.exp %24 : vector<32x128xf32>
    %cst_18 = arith.constant 0.000000e+00 : f32
    %26 = vector.broadcast %cst_18 : f32 to vector<32x128xf32>
    %27 = arith.cmpf oge, %21, %26 : vector<32x128xf32>
    %cst_19 = arith.constant 1.000000e+00 : f32
    %28 = vector.broadcast %cst_19 : f32 to vector<32x128xf32>
    %29 = arith.select %27, %28, %25 : vector<32x128xi1>, vector<32x128xf32>
    %cst_20 = arith.constant 1.000000e+00 : f32
    %30 = vector.broadcast %cst_20 : f32 to vector<32x128xf32>
    %31 = arith.addf %30, %25 : vector<32x128xf32>
    %32 = tpu.reciprocal %31 {approx = true} : vector<32x128xf32> -> vector<32x128xf32>
    %33 = arith.mulf %29, %32 : vector<32x128xf32>
    %c0_21 = arith.constant 0 : index
    %c0_22 = arith.constant 0 : index
    %34 = vector.load %arg8[%c0_21, %c0_22] : memref<32x128xf32, #tpu.memory_space<vmem>>, vector<32x128xf32>
    tpu.vector_store %arg8[%c0_21, %c0_22], %33 {strides = array<i32>} : memref<32x128xf32, #tpu.memory_space<vmem>>, vector<32x128xf32>,
    return
  }
  func.func @transform_0(%arg0: i32) -> (i32, i32) {
    %c0_i32 = arith.constant 0 : i32
    %c0_i32_0 = arith.constant 0 : i32
    return %arg0, %c0_i32 : i32, i32
  }
  func.func @transform_1(%arg0: i32) -> (i32, i32) {
    %c0_i32 = arith.constant 0 : i32
    %c0_i32_0 = arith.constant 0 : i32
    %c0_i32_1 = arith.constant 0 : i32
    return %c0_i32, %c0_i32_0 : i32, i32
  }
  func.func @transform_2(%arg0: i32) -> (i32, i32) {
    %c0_i32 = arith.constant 0 : i32
    %c0_i32_0 = arith.constant 0 : i32
    %c0_i32_1 = arith.constant 0 : i32
    return %c0_i32, %c0_i32_0 : i32, i32
  }
  func.func @transform_3(%arg0: i32) -> (i32, i32) {
    %c0_i32 = arith.constant 0 : i32
    %c0_i32_0 = arith.constant 0 : i32
    %c0_i32_1 = arith.constant 0 : i32
    return %c0_i32, %c0_i32_0 : i32, i32
  }
  func.func @transform_4(%arg0: i32) -> (i32, i32) {
    %c0_i32 = arith.constant 0 : i32
    %c0_i32_0 = arith.constant 0 : i32
    %c0_i32_1 = arith.constant 0 : i32
    return %c0_i32, %c0_i32_0 : i32, i32
  }
  func.func @transform_5(%arg0: i32) -> (i32, i32) {
    %c0_i32 = arith.constant 0 : i32
    %c0_i32_0 = arith.constant 0 : i32
    %c0_i32_1 = arith.constant 0 : i32
    return %c0_i32, %c0_i32_0 : i32, i32
  }
  func.func @transform_6(%arg0: i32) -> (i32, i32) {
    %c0_i32 = arith.constant 0 : i32
    %c0_i32_0 = arith.constant 0 : i32
    %c0_i32_1 = arith.constant 0 : i32
    return %c0_i32, %c0_i32_0 : i32, i32
  }
  func.func @transform_7(%arg0: i32) -> (i32, i32) {
    %c0_i32 = arith.constant 0 : i32
    %c0_i32_0 = arith.constant 0 : i32
    return %arg0, %c0_i32 : i32, i32
  }
}

</mosaic_0001>

<bundles_post_ra>
// kernel: mlp_forward.1
= control target key start
LH: loop header
LB: loop body
LE: loop exit
PB: predicated region body
PF: predicated region fallthrough
CT: control target
= control target key end

     0   :  { %12 = vsyncpa [#allocation3], 0  ;;  %s1072_s24 = smov 0   ;;  %s1196_s0 = inlined_call_operand.vmem [shape: bf16[64,128], index: 0, kind: input, shape index: {}]   ;;  %s1197_s1 = inlined_call_operand.vmem [shape: bf16[128,128], index: 1, kind: input, shape index: {}]   ;;  %s1198_s2 = inlined_call_operand.vmem [shape: f32[1,128], index: 2, kind: input, shape index: {}]   ;;  %s1199_s3 = inlined_call_operand.vmem [shape: bf16[128,128], index: 3, kind: input, shape index: {}]   ;;  %s1200_s4 = inlined_call_operand.vmem [shape: f32[1,128], index: 4, kind: input, shape index: {}]   ;;  %s1201_s5 = inlined_call_operand.hbm [shape: bf16[128,128], index: 5, kind: input, shape index: {}]   ;;  %s1202_s6 = inlined_call_operand.vmem [shape: f32[1,128], index: 6, kind: input, shape index: {}]   ;;  %s1203_s7 = inlined_call_operand.vmem [shape: f32[64,128], index: 7, kind: output, shape index: {}]  }
   0x1 LB: > { %s794_s25 = sadd.s32 4294967295, %s1027_s24   ;;  %p796_p0 = scmp.ge.s32.totalorder %s1027_s24, 1  ;;  %s1027_s24 = sphi %s1072_s24, %s18_s24  }
   0x2   : > { %p201_p1 = scmp.lt.s32.totalorder %s1027_s24, 3  ;;  %s1029_s26 = smov [#allocation2]  }
   0x3   : > { %s225_s27 = sshll.u32 %s1029_s26, 4  ;;  %p1086_p3 = scmp.eq.s32.totalorder %s794_s25, 0  ;;  %s226_s27 = int_to_ptr.vmem [resolvable:$true] %s225_s27 }
   0x4   : > { %p1080_p2 = pnand %p796_p0, %p201_p1  ;;  %s989_s10 = scalar_lea.hbm %s1201_s5, 1024 }
   0x5   : > { %s1208_s29 = scalar_select %p1086_p3, 1, 0 }
   0x6   : > { %s1207_s28 = scalar_select %p1080_p2, 1, 0 }
   0x7   : > { %p930_p4 = pneg %p1080_p2  ;;  %p990_p6 = scmp.ne.s32.totalorder %s1201_s5, %s989_s10 }
   0x8   : > { %p996_p10 = scmp.lt.u32.totalorder %s989_s10, %s1201_s5 }
   0x9   : > { %p1094_p5 = pnand %p1086_p3, %p930_p4 }
   0xb   : > { %p991_p7 = pneg %p1094_p5 }
   0xd   : > { %p992_p8 = pnand %p991_p7, %p990_p6 }
   0xf   : > { %p993_p9 = pneg %p992_p8 }
  0x11   : > { %p998_p11 = pnand %p996_p10, %p993_p9 }
  0x13   : > { %1001 = shalt.err (!%p998_p11)
}
  0x14   : > { %s1002_s15 = scalar_lea.vmem %s226_s27, 1024  ;;  %p1010_p1 = scmp.lt.s32.totalorder %s226_s27, %s226_s27 }
  0x15   : > { %p1003_p12 = scmp.ne.s32.totalorder %s226_s27, %s1002_s15  ;;  %p1011_p4 = scmp.lt.s32.totalorder %s1002_s15, %s1002_s15 }
  0x17   : > { %p1005_p13 = pnand %p1003_p12, %p991_p7  ;;  %p1012_p3 = por %p1011_p4, %p1010_p1 }
  0x19   : > { %p1006_p0 = pneg %p1005_p13 }
  0x1b   : > { %p1013_p2 = pnand %p1012_p3, %p1006_p0 }
  0x1d   : > { %1016 = shalt.err (!%p1013_p2)
}
  0x1e   : > { %s1030_s16 = smov 64   ;;  %s1031_s17 = smov 4  }
  0x1f   : > { %933 = dma.hbm_to_vmem [thread:$0]  (!%p1094_p5), %s1201_s5, 1024, %s226_s27, [#allocation3], %s1030_s16, %s1030_s16, %s1031_s17  }
  0x20   : > { %p1210_p6 = scmp.ne.s32.totalorder %s1207_s28, 0 }
  0x21   : > { %p1211_p8 = scmp.ne.s32.totalorder (!%p1210_p6), %s1208_s29, 0 }
  0x22   : > { %253 = sbr.rel (%p1210_p6) target bundleno = 769 (0x301), region = 48 }
  0x29   : > { %1022 = dma.done.wait (%p1211_p8), [#allocation3], 1024  }
  0x2a   : > { %1024 = vsyncadd (%p1211_p8), [#allocation3], 4294966272  ;;  %s801_s20 = sshll.u32 %s794_s25, 2  ;;  %v947_v0 = vld [vmem:[%s1197_s1] sm:$0xff]   ;;  %v948_v1 = vld [vmem:[%s1197_s1 + $0x8] sm:$0xff]  }
  0x2b   : > { %p286_p2 = scmp.lt.s32.totalorder %s801_s20, 7  ;;  %866 = vmatprep.subr.bf16.mxu0 %v947_v0  ;;  %v949_v2 = vld [vmem:[%s1197_s1 + $0x10] sm:$0xff]   ;;  %v950_v3 = vld [vmem:[%s1197_s1 + $0x18] sm:$0xff]   ;;  %v957_v5 = vld [vmem:[%s1199_s3] sm:$0xff]  }
  0x2c   : > { %867 = vmatpush3.bf16.msra.mxu0 %v947_v0  ;;  %v958_v6 = vld [vmem:[%s1199_s3 + $0x8] sm:$0xff]   ;;  %v951_v7 = vld [vmem:[%s1197_s1 + $0x20] sm:$0xff]   ;;  %886 = vmatprep.subr.bf16.mxu1 %v957_v5  ;;  %v959_v8 = vld [vmem:[%s1199_s3 + $0x10] sm:$0xff]  }
  0x2d   : > { %s1213_s20 = smov (!%p286_p2, %s801_s20), 7  ;;  %868 = vmatprep.subr.bf16.mxu0 %v948_v1  ;;  %887 = vmatpush3.bf16.msra.mxu1 %v957_v5  ;;  %v952_v9 = vld [vmem:[%s1197_s1 + $0x28] sm:$0xff]   ;;  %v960_v10 = vld [vmem:[%s1199_s3 + $0x18] sm:$0xff]   ;;  %v953_v11 = vld [vmem:[%s1197_s1 + $0x30] sm:$0xff]  }
  0x2e   : > { %s802_s27 = sshll.u32 %s1213_s20, 2  ;;  %888 = vmatprep.subr.bf16.mxu1 %v958_v6  ;;  %v961_v12 = vld [vmem:[%s1199_s3 + $0x20] sm:$0xff]   ;;  %v954_v13 = vld [vmem:[%s1197_s1 + $0x38] sm:$0xff]   ;;  %v962_v14 = vld [vmem:[%s1199_s3 + $0x28] sm:$0xff]   ;;  %s804_s21 = sshll.u32 %s1213_s20, 3 }
  0x2f   : > { %s1137_s8 = scalar_lea.vmem %s1196_s0, %s802_s27  ;;  %v963_v16 = vld [vmem:[%s1199_s3 + $0x30] sm:$0xff]   ;;  %v964_v17 = vld [vmem:[%s1199_s3 + $0x38] sm:$0xff]   ;;  %v965_v18 = vld [vmem:[#allocation2] sm:$0xff]   ;;  %s295_s26 = scalar_lea.vmem %s1203_s7, %s804_s21 }
  0x30   : > { %869 = vmatpush3.bf16.msra.mxu0 %v948_v1  ;;  %v955_v4 = vld [vmem:[%s1137_s8] sm:$0xff]   ;;  %v956_v15 = vld [vmem:[%s1137_s8 + $0x8] sm:$0xff]   ;;  %v967_v20 = vld [vmem:[#allocation2 + $0x10] sm:$0xff]  }
  0x31   : > { %870 = vmatprep.subr.bf16.mxu0 %v949_v2  ;;  %882 = vmatprep.mubr.bf16.mxu0 %v955_v4  ;;  %v966_v19 = vld [vmem:[#allocation2 + $0x8] sm:$0xff]   ;;  %v968_v21 = vld [vmem:[#allocation2 + $0x18] sm:$0xff]   ;;  %v969_v22 = vld [vmem:[#allocation2 + $0x20] sm:$0xff]  }
  0x32   : > { %889 = vmatpush3.bf16.msra.mxu1 %v958_v6  ;;  %v970_v23 = vld [vmem:[#allocation2 + $0x28] sm:$0xff]   ;;  %v805_v24 = vld [vmem:[%s1198_s2] ss:$0 sm:$0xff]  ;;  %v971_v39 = vld [vmem:[#allocation2 + $0x30] sm:$0xff]  }
  0x33   : > { %890 = vmatprep.subr.bf16.mxu1 %v959_v8  ;;  %v972_v40 = vld [vmem:[#allocation2 + $0x38] sm:$0xff]   ;;  %v816_v41 = vld [vmem:[%s1200_s4] ss:$0 sm:$0xff] }
  0x34   : > { %871 = vmatpush3.bf16.msra.mxu0 %v949_v2  ;;  %v825_v56 = vld [vmem:[%s1202_s6] ss:$0 sm:$0xff] }
  0x35   : > { %872 = vmatprep.subr.bf16.mxu0 %v950_v3 }
  0x36   : > { %891 = vmatpush3.bf16.msra.mxu1 %v959_v8 }
  0x37   : > { %892 = vmatprep.subr.bf16.mxu1 %v960_v10 }
  0x38   : > { %873 = vmatpush3.bf16.msra.mxu0 %v950_v3 }
  0x39   : > { %874 = vmatprep.subr.bf16.mxu0 %v951_v7 }
  0x3a   : > { %893 = vmatpush3.bf16.msra.mxu1 %v960_v10 }
  0x3b   : > { %894 = vmatprep.subr.bf16.mxu1 %v961_v12 }
  0x3c   : > { %875 = vmatpush3.bf16.msra.mxu0 %v951_v7 }
  0x3d   : > { %876 = vmatprep.subr.bf16.mxu0 %v952_v9 }
  0x3e   : > { %895 = vmatpush3.bf16.msra.mxu1 %v961_v12 }
  0x3f   : > { %896 = vmatprep.subr.bf16.mxu1 %v962_v14 }
  0x40   : > { %877 = vmatpush3.bf16.msra.mxu0 %v952_v9 }
  0x41   : > { %878 = vmatprep.subr.bf16.mxu0 %v953_v11 }
  0x42   : > { %897 = vmatpush3.bf16.msra.mxu1 %v962_v14 }
  0x43   : > { %898 = vmatprep.subr.bf16.mxu1 %v963_v16 }
  0x44   : > { %879 = vmatpush3.bf16.msra.mxu0 %v953_v11 }
  0x45   : > { %880 = vmatprep.subr.bf16.mxu0 %v954_v13 }
  0x46   : > { %899 = vmatpush3.bf16.msra.mxu1 %v963_v16 }
  0x47   : > { %900 = vmatprep.subr.bf16.mxu1 %v964_v17 }
  0x48   : > { %881 = vmatpush3.bf16.msra.mxu0 %v954_v13 }
  0x49   : > { %906 = vmatprep.subr.bf16.mxu0 %v965_v18 }
  0x4a   : > { %901 = vmatpush3.bf16.msra.mxu1 %v964_v17 }
  0x4b   : > { %883 = vmatmul.mubr.bf16.vlgmr.msra.gmra.mrb[0].mxu0 %v956_v15 }
  0x4c   : > { %907 = vmatpush3.bf16.msra.mxu0 %v965_v18 }
  0x4d   : > { %908 = vmatprep.subr.bf16.mxu0 %v966_v19 }
  0x50   : > { %909 = vmatpush3.bf16.msra.mxu0 %v966_v19 }
  0x51   : > { %910 = vmatprep.subr.bf16.mxu0 %v967_v20 }
  0x54   : > { %911 = vmatpush3.bf16.msra.mxu0 %v967_v20 }
  0x55   : > { %912 = vmatprep.subr.bf16.mxu0 %v968_v21 }
  0x58   : > { %913 = vmatpush3.bf16.msra.mxu0 %v968_v21 }
  0x59   : > { %914 = vmatprep.subr.bf16.mxu0 %v969_v22 }
  0x5c   : > { %915 = vmatpush3.bf16.msra.mxu0 %v969_v22 }
  0x5d   : > { %916 = vmatprep.subr.bf16.mxu0 %v970_v23 }
  0x60   : > { %917 = vmatpush3.bf16.msra.mxu0 %v970_v23 }
  0x61   : > { %918 = vmatprep.subr.bf16.mxu0 %v971_v39 }
  0x64   : > { %919 = vmatpush3.bf16.msra.mxu0 %v971_v39 }
  0x65   : > { %920 = vmatprep.subr.bf16.mxu0 %v972_v40 }
  0x68   : > { %921 = vmatpush3.bf16.msra.mxu0 %v972_v40 }
 0x11e   : > { %v884_v25 = vpop.f32.mrb[0].mxu0 }
 0x11f   : > { %v428_v26 = vadd.f32 %v884_v25, %v805_v24  ;;  %v419_v27 = vpop.f32.mrb[1].mxu0 }
 0x120   : > { %v420_v28 = vadd.f32 %v805_v24, %v419_v27  ;;  %v885_v29 = vpop.f32.mrb[2].mxu0 }
 0x121   : > { %v431_v30 = vadd.f32 %v885_v29, %v805_v24  ;;  %v422_v31 = vpop.f32.mrb[3].mxu0  ;;  %v436_v33 = vmax.f32 %v428_v26, 0.0 }
 0x122   : > { %v423_v32 = vadd.f32 %v805_v24, %v422_v31  ;;  %v434_v35 = vmax.f32 %v420_v28, 0.0 }
 0x123   : > { %v437_v34 = vmax.f32 %v431_v30, 0.0 }
 0x124   : > { %v435_v36 = vmax.f32 %v423_v32, 0.0 }
 0x125   : > { %v439_v37 = vpack.c.bf16 %v437_v34, %v436_v33 }
 0x126   : > { %v438_v38 = vpack.c.bf16 %v435_v36, %v434_v35 }
 0x128   : > { %902 = vmatprep.mubr.bf16.mxu1 %v438_v38 }
 0x129   : > { %903 = vmatmul.mubr.bf16.vlgmr.msra.gmra.mrb[0].mxu1 %v439_v37 }
 0x1fc   : > { %v904_v42 = vpop.f32.mrb[0].mxu1 }
 0x1fd   : > { %v554_v43 = vadd.f32 %v904_v42, %v816_v41  ;;  %v545_v44 = vpop.f32.mrb[1].mxu1 }
 0x1fe   : > { %v546_v45 = vadd.f32 %v816_v41, %v545_v44  ;;  %v905_v46 = vpop.f32.mrb[2].mxu1 }
 0x1ff   : > { %v557_v47 = vadd.f32 %v905_v46, %v816_v41  ;;  %v548_v48 = vpop.f32.mrb[3].mxu1  ;;  %v562_v50 = vmax.f32 %v554_v43, 0.0 }
 0x200   : > { %v549_v49 = vadd.f32 %v816_v41, %v548_v48  ;;  %v560_v52 = vmax.f32 %v546_v45, 0.0 }
 0x201   : > { %v563_v51 = vmax.f32 %v557_v47, 0.0 }
 0x202   : > { %v561_v53 = vmax.f32 %v549_v49, 0.0 }
 0x203   : > { %v565_v54 = vpack.c.bf16 %v563_v51, %v562_v50 }
 0x204   : > { %v564_v55 = vpack.c.bf16 %v561_v53, %v560_v52 }
 0x206   : > { %922 = vmatprep.mubr.bf16.mxu0 %v564_v55 }
 0x207   : > { %923 = vmatmul.mubr.bf16.vlgmr.msra.gmra.mrb[4].mxu0 %v565_v54 }
 0x2da   : > { %v924_v57 = vpop.f32.mrb[4].mxu0 }
 0x2db   : > { %v680_v58 = vadd.f32 %v924_v57, %v825_v56  ;;  %v671_v59 = vpop.f32.mrb[5].mxu0 }
 0x2dc   : > { %v672_v60 = vadd.f32 %v825_v56, %v671_v59  ;;  %v925_v61 = vpop.f32.mrb[6].mxu0 }
 0x2dd   : > { %v688_v62 = vand.u32 2147483647, %v680_v58  ;;  %v683_v63 = vadd.f32 %v925_v61, %v825_v56  ;;  %v674_v0 = vpop.f32.mrb[7].mxu0  ;;  %vm704_vm2 = vcmp.ge.f32.partialorder %v680_v58, 0.0 }
 0x2de   : > { %v686_v1 = vand.u32 2147483647, %v672_v60  ;;  %v675_v2 = vadd.f32 %v825_v56, %v674_v0  ;;  %vm702_vm0 = vcmp.ge.f32.partialorder %v672_v60, 0.0 }
 0x2df   : > { %v692_v3 = vsub.f32 0.0, %v688_v62  ;;  %v689_v4 = vand.u32 2147483647, %v683_v63  ;;  %vm705_vm3 = vcmp.ge.f32.partialorder %v683_v63, 0.0 }
 0x2e0   : > { %v690_v5 = vsub.f32 0.0, %v686_v1  ;;  %v687_v6 = vand.u32 2147483647, %v675_v2  ;;  %vm703_vm1 = vcmp.ge.f32.partialorder %v675_v2, 0.0 }
 0x2e1   : > { %v698_v7 = vmul.f32 1.442695, %v692_v3  ;;  %v693_v8 = vsub.f32 0.0, %v689_v4 }
 0x2e2   : > { %v694_v9 = vmul.f32 1.442695, %v690_v5  ;;  %v691_v10 = vsub.f32 0.0, %v687_v6 }
 0x2e3   : > { %973 = vpow2.f32 %v698_v7  ;;  %v700_v11 = vmul.f32 1.442695, %v693_v8 }
 0x2e4   : > { %975 = vpow2.f32 %v694_v9  ;;  %v696_v12 = vmul.f32 1.442695, %v691_v10 }
 0x2e5   : > { %977 = vpow2.f32 %v700_v11 }
 0x2e6   : > { %979 = vpow2.f32 %v696_v12 }
 0x2ed   : > { %v974_v13 = vpop.eup %973 }
 0x2ee   : > { %v976_v14 = vpop.eup %975  ;;  %v712_v15 = vadd.f32 1.0, %v974_v13  ;;  %v708_v28 = vsel %vm704_vm2, 1.0, %v974_v13 }
 0x2ef   : > { %v978_v16 = vpop.eup %977  ;;  %v710_v17 = vadd.f32 1.0, %v976_v14  ;;  %v706_v23 = vsel %vm702_vm0, 1.0, %v976_v14 }
 0x2f0   : > { %v980_v18 = vpop.eup %979  ;;  %981 = vrcp.f32 %v712_v15  ;;  %v713_v19 = vadd.f32 1.0, %v978_v16  ;;  %v709_v31 = vsel %vm705_vm3, 1.0, %v978_v16 }
 0x2f1   : > { %983 = vrcp.f32 %v710_v17  ;;  %v711_v20 = vadd.f32 1.0, %v980_v18  ;;  %v707_v27 = vsel %vm703_vm1, 1.0, %v980_v18 }
 0x2f2   : > { %985 = vrcp.f32 %v713_v19 }
 0x2f3   : > { %987 = vrcp.f32 %v711_v20 }
 0x2fa   : > { %v982_v21 = vpop.eup %981 }
 0x2fb   : > { %v984_v22 = vpop.eup %983  ;;  %v720_v30 = vmul.f32 %v982_v21, %v708_v28 }
 0x2fc   : > { %v986_v24 = vpop.eup %985  ;;  %v718_v25 = vmul.f32 %v984_v22, %v706_v23 }
 0x2fd   : > { %v988_v26 = vpop.eup %987  ;;  %v721_v32 = vmul.f32 %v986_v24, %v709_v31  ;;  %724 = vst [vmem:[%s295_s26 + $0x10] sm:$0xff] %v720_v30 }
 0x2fe   : > { %722 = vst [vmem:[%s295_s26] sm:$0xff] %v718_v25  ;;  %v719_v29 = vmul.f32 %v988_v26, %v707_v27 }
 0x2ff   : > { %725 = vst [vmem:[%s295_s26 + $0x18] sm:$0xff] %v721_v32 }
 0x300   : > { %723 = vst [vmem:[%s295_s26 + $0x8] sm:$0xff] %v719_v29 }
 0x301 PF: > { %s18_s24 = sadd.s32 1, %s1027_s24  }
 0x302   : > { %p15_p3 = scmp.ge.s32.totalorder %s18_s24, 4  }
 0x304   :  { %17 = sbr.rel (!%p15_p3) target bundleno = 1 (0x1), region = 83 }
 0x30b   :  { %748 = vsyncpa [#allocation3], 1 }
 0x30c   :  { %750 = vsyncpa [#allocation3 + $0x1], 1 }

</bundles_post_ra>
